<compile_context>
chip_gen: v6e
topology: v6e:2x2x1
jax: 0.10.0
libtpu: 0.0.40
codegen_flags: <defaults>
</compile_context>

<pallas_src>
import functools

import jax
import jax.numpy as jnp
from jax.experimental import pallas as pl
from jax.experimental.pallas import tpu as pltpu

_HIDDEN = 256


def _round_up(x, m):
    return ((x + m - 1) // m) * m


@functools.lru_cache(maxsize=1)
def _tpu_generation():
    """Per-generation VMEM budget / scoped limit and TensorCore count."""
    kind = ""
    try:
        kind = jax.devices()[0].device_kind.lower()
    except Exception:
        pass
    if "v7" in kind:
        # v7x: 64 MiB VMEM per TensorCore, 2 TensorCores per chip.
        return {"vmem_budget": 40 << 20, "vmem_limit": 56 << 20, "num_tc": 2}
    if "v5" in kind or "v6" in kind:
        # v5e/v5p/v6e: 128 MiB VMEM, 1 TensorCore.
        return {"vmem_budget": 96 << 20, "vmem_limit": 112 << 20, "num_tc": 1}
    # Unknown chip: conservative budget that fits every generation.
    return {"vmem_budget": 40 << 20, "vmem_limit": 56 << 20, "num_tc": 1}


def _derive_tile_m(n, feat, x_itemsize, tile_m, gen):
    """Row-tile size from shapes + the per-generation VMEM budget (static Python ints)."""
    h = _HIDDEN
    if tile_m is not None:
        desired = int(tile_m)
    elif feat <= 512:
        desired = 4096        # small F: big tiles to amortize ~0.35us/step overhead
    elif feat <= 2048:
        desired = 2048
    else:
        desired = 1024
    # Working set: 2 x buffers + 2 W1 buffers (grid-invariant but still double-buffered
    # by the pipeline) + f32 h + bf16 h (+ an in-kernel bf16 copy of x when x is f32).
    fixed = 4 * feat * h + (1 << 20)
    per_row = 2 * feat * x_itemsize + 6 * h
    if x_itemsize > 2:
        per_row += 2 * feat
    tm_vmem = max(128, (gen["vmem_budget"] - fixed) // per_row)
    tm = min(desired, tm_vmem)
    # v7x megacore: keep >= 2 grid steps per TensorCore so "parallel" actually shards.
    if gen["num_tc"] > 1 and n >= 2 * gen["num_tc"] * 128:
        tm = min(tm, _round_up(pl.cdiv(n, 2 * gen["num_tc"]), 128))
    tm = _round_up(max(tm, 128), 128)   # lane-dense out blocks need tm % 128 == 0
    if tm >= n:
        tm = _round_up(n, 8)            # single grid step: out block spans full output
    return tm


def _classifier_kernel(x_ref, w1_ref, b1_ref, w2_ref, b2_ref, o_ref):
    # x_ref : (TM, F)  input rows (bf16 preferred; f32 is cast per-tile in VMEM)
    # w1_ref: (F, H)   bf16 first-layer weight (resident across the grid)
    # b1_ref: (1, H)   f32 first-layer bias
    # w2_ref: (1, H)   bf16 second-layer weight as a row
    # b2_ref: (1, 1)   f32 second-layer bias (SMEM scalar)
    # o_ref : (1, TM)  f32 logits, lane-dense row
    x = x_ref[...].astype(jnp.bfloat16)
    h = jnp.dot(x, w1_ref[...].astype(jnp.bfloat16),
                preferred_element_type=jnp.float32)            # (TM, H) on the MXU
    h = jnp.maximum(h + b1_ref[...], 0.0)                      # bias + ReLU, f32 VPU
    # Second Linear (H -> 1) as w2 @ h^T on the MXU (NT dot_general): produces the
    # lane-dense (1, TM) output row directly and keeps the VPU/XLU free at small F.
    y = jax.lax.dot_general(
        w2_ref[...].astype(jnp.bfloat16), h.astype(jnp.bfloat16),
        dimension_numbers=(((1,), (1,)), ((), ())),
        preferred_element_type=jnp.float32)                    # (1, TM)
    o_ref[...] = (y + b2_ref[0, 0]).astype(o_ref.dtype)


@functools.partial(jax.jit, static_argnames=("tm", "vmem_limit"))
def _forward_2d(xf, w1, b1_row, w2_row, b2_s, *, tm, vmem_limit):
    n, feat = xf.shape
    h = w1.shape[1]
    grid = pl.cdiv(n, tm)
    n_pad = grid * tm

    cost = pl.CostEstimate(
        flops=2 * n * feat * h + 2 * n * h,
        transcendentals=0,
        bytes_accessed=n * feat * xf.dtype.itemsize + feat * h * 2 + 2 * h * 4 + n * 4 + 4,
    )

    return pl.pallas_call(
        _classifier_kernel,
        out_shape=jax.ShapeDtypeStruct((1, n_pad), jnp.float32),
        grid_spec=pltpu.PrefetchScalarGridSpec(
            num_scalar_prefetch=0,
            grid=(grid,),
            in_specs=[
                pl.BlockSpec((tm, feat), lambda i: (i, 0)),          # x row tile
                pl.BlockSpec((feat, h), lambda i: (0, 0)),           # W1 (resident bf16)
                pl.BlockSpec((1, h), lambda i: (0, 0)),              # b1
                pl.BlockSpec((1, h), lambda i: (0, 0)),              # w2 row
                pl.BlockSpec(memory_space=pltpu.MemorySpace.SMEM),   # b2 scalar
            ],
            out_specs=pl.BlockSpec((1, tm), lambda i: (0, i)),       # lane-dense out
        ),
        compiler_params=pltpu.CompilerParams(
            dimension_semantics=("parallel",),    # shard row grid across TCs on v7x
            vmem_limit_bytes=vmem_limit,
        ),
        cost_estimate=cost,
    )(xf, w1, b1_row, w2_row, b2_s)


def classifier_module_forward(x, params, *, tile_m=None):
    """Pallas forward of ClassifierModule: Linear(F,256) -> ReLU -> Linear(256,1).

    x      : (..., F) bf16 (preferred; halves HBM reads) or f32
    params : tuple from prepare_params() (pre-cast once, NOT per call)
    returns: (..., 1) f32 logits (no sigmoid — matches the module's forward()).
    """
    w1, b1_row, w2_row, b2_s = params
    orig_shape = x.shape
    feat = orig_shape[-1]
    xf = x.reshape(-1, feat)
    n = xf.shape[0]
    gen = _tpu_generation()
    tm = _derive_tile_m(n, feat, jnp.dtype(xf.dtype).itemsize, tile_m, gen)
    out = _forward_2d(xf, w1, b1_row, w2_row, b2_s, tm=tm, vmem_limit=gen["vmem_limit"])
    return out[0, :n].reshape(orig_shape[:-1] + (1,))


def prepare_params(w1, b1, w2, b2):
    """One-time conversion to kernel layouts/dtypes.  Call once at init, not per
    forward: keeping W1 persistently in bf16 avoids an extra HBM read+write pass
    over W1 on every call."""
    h = w1.shape[1]
    return (
        jnp.asarray(w1, jnp.bfloat16),                                   # (F, H)
        jnp.asarray(b1, jnp.float32).reshape(1, h),                      # (1, H)
        jnp.asarray(w2, jnp.float32).reshape(1, h).astype(jnp.bfloat16), # (1, H)
        jnp.asarray(b2, jnp.float32).reshape(1, 1),                      # (1, 1)
    )


def init_params(key, feature_size, hidden=_HIDDEN):
    """PyTorch-style uniform(-1/sqrt(fan_in), 1/sqrt(fan_in)) init.
    Weights stored transposed (fan_in, fan_out) relative to torch.nn.Linear."""
    k1, k2, k3, k4 = jax.random.split(key, 4)
    lim1 = 1.0 / jnp.sqrt(float(feature_size))
    lim2 = 1.0 / jnp.sqrt(float(hidden))
    w1 = jax.random.uniform(k1, (feature_size, hidden), jnp.float32, -lim1, lim1)
    b1 = jax.random.uniform(k2, (hidden,), jnp.float32, -lim1, lim1)
    w2 = jax.random.uniform(k3, (hidden, 1), jnp.float32, -lim2, lim2)
    b2 = jax.random.uniform(k4, (1,), jnp.float32, -lim2, lim2)
    return w1, b1, w2, b2


def _reference_forward(x2d, w1, b1, w2, b2):
    # Mirror the kernel numerics: bf16 matmul operands, f32 accumulation, f32 elementwise.
    xr = x2d.astype(jnp.bfloat16).astype(jnp.float32)
    w1r = w1.astype(jnp.bfloat16).astype(jnp.float32)
    hh = jnp.maximum(jnp.dot(xr, w1r, precision=jax.lax.Precision.HIGHEST) + b1, 0.0)
    hr = hh.astype(jnp.bfloat16).astype(jnp.float32)
    w2r = w2.astype(jnp.bfloat16).astype(jnp.float32)
    return jnp.dot(hr, w2r, precision=jax.lax.Precision.HIGHEST) + b2


if __name__ == "__main__":
    # Small shapes implied by the module: x is (batch, seq, feature_size).
    batch, seq, feature_size = 2, 128, 128
    key = jax.random.PRNGKey(0)
    k_x, k_p = jax.random.split(key)

    x = jax.random.normal(k_x, (batch, seq, feature_size), dtype=jnp.float32)
    x_bf16 = x.astype(jnp.bfloat16)   # bf16 activations: half the HBM read traffic

    w1, b1, w2, b2 = init_params(k_p, feature_size)
    params = prepare_params(w1, b1, w2, b2)   # one-time cast, outside the forward

    ref = _reference_forward(
        x_bf16.reshape(-1, feature_size), w1, b1, w2, b2
    ).reshape(batch, seq, 1)

    # 1) auto-derived tiling (single grid step at this small size)
    out = jax.block_until_ready(classifier_module_forward(x_bf16, params))
    assert out.shape == (batch, seq, 1), out.shape
    err = float(jnp.max(jnp.abs(out - ref)))
    assert jnp.allclose(out, ref, atol=2e-3, rtol=2e-3), f"max abs err = {err}"

    # 2) force tile_m=128 so the row grid has 2 steps (exercises multi-step tiling and
    #    the lane-dense (1, tm) output blocks with a moving index_map)
    out2 = jax.block_until_ready(
        classifier_module_forward(x_bf16, params, tile_m=128))
    err2 = float(jnp.max(jnp.abs(out2 - ref)))
    assert out2.shape == (batch, seq, 1), out2.shape
    assert jnp.allclose(out2, ref, atol=2e-3, rtol=2e-3), f"max abs err = {err2}"

    print("KERNEL_OK")
</pallas_src>

<mosaic_0001>
module attributes {stable_mosaic.version = 11 : i64} {
  func.func @_classifier_kernel(%arg0: i32, %arg1: memref<256x128xbf16, #tpu.memory_space<vmem>>, %arg2: memref<128x256xbf16, #tpu.memory_space<vmem>>, %arg3: memref<1x256xf32, #tpu.memory_space<vmem>>, %arg4: memref<1x256xbf16, #tpu.memory_space<vmem>>, %arg5: memref<1x1xf32, #tpu.memory_space<smem>>, %arg6: memref<1x256xf32, #tpu.memory_space<vmem>>) attributes {dimension_semantics = [#tpu.dimension_semantics<parallel>], iteration_bounds = array<i64: 1>, scalar_prefetch = 0 : i64, scratch_operands = 0 : i64, tpu.core_type = #tpu.core_type<tc>, window_params = [{transform_indices = @transform_0, window_bounds = array<i64: 256, 128>}, {pipeline_mode = #tpu.pipeline_mode<synchronous>, transform_indices = @transform_1, window_bounds = array<i64: 128, 256>}, {pipeline_mode = #tpu.pipeline_mode<synchronous>, transform_indices = @transform_2, window_bounds = array<i64: 1, 256>}, {pipeline_mode = #tpu.pipeline_mode<synchronous>, transform_indices = @transform_3, window_bounds = array<i64: 1, 256>}, {transform_indices = @transform_4, window_bounds = array<i64: 1, 1>}, {transform_indices = @transform_5, window_bounds = array<i64: 1, 256>}]} {
    %c0 = arith.constant 0 : index
    %c0_0 = arith.constant 0 : index
    %0 = vector.load %arg1[%c0, %c0_0] : memref<256x128xbf16, #tpu.memory_space<vmem>>, vector<256x128xbf16>
    %c0_1 = arith.constant 0 : index
    %c0_2 = arith.constant 0 : index
    %1 = vector.load %arg2[%c0_1, %c0_2] : memref<128x256xbf16, #tpu.memory_space<vmem>>, vector<128x256xbf16>
    %cst = arith.constant dense<0.000000e+00> : vector<256x256xf32>
    %2 = tpu.matmul %0, %1, %cst {dimension_numbers = #tpu.dot_dimension_numbers<[1], [0], [0], [1], [0, 0, 1, 1], [], []>} : vector<256x128xbf16>, vector<128x256xbf16>, vector<256x256xf32> -> vector<256x256xf32>
    %c0_3 = arith.constant 0 : index
    %c0_4 = arith.constant 0 : index
    %3 = vector.load %arg3[%c0_3, %c0_4] : memref<1x256xf32, #tpu.memory_space<vmem>>, vector<1x256xf32>
    %4 = vector.broadcast %3 : vector<1x256xf32> to vector<256x256xf32>
    %5 = arith.addf %2, %4 : vector<256x256xf32>
    %cst_5 = arith.constant 0.000000e+00 : f32
    %6 = vector.broadcast %cst_5 : f32 to vector<256x256xf32>
    %7 = arith.maximumf %5, %6 : vector<256x256xf32>
    %c0_6 = arith.constant 0 : index
    %c0_7 = arith.constant 0 : index
    %8 = vector.load %arg4[%c0_6, %c0_7] : memref<1x256xbf16, #tpu.memory_space<vmem>>, vector<1x256xbf16>
    %9 = arith.truncf %7 : vector<256x256xf32> to vector<256x256xbf16>
    %cst_8 = arith.constant dense<0.000000e+00> : vector<1x256xf32>
    %10 = tpu.matmul %8, %9, %cst_8 {dimension_numbers = #tpu.dot_dimension_numbers<[1], [1], [0], [0], [0, 0, 1, 0], [], []>} : vector<1x256xbf16>, vector<256x256xbf16>, vector<1x256xf32> -> vector<1x256xf32>
    %c0_9 = arith.constant 0 : index
    %c0_10 = arith.constant 0 : index
    %11 = memref.load %arg5[%c0_9, %c0_10] : memref<1x1xf32, #tpu.memory_space<smem>>
    %12 = vector.broadcast %11 : f32 to vector<1x256xf32>
    %13 = arith.addf %10, %12 : vector<1x256xf32>
    %c0_11 = arith.constant 0 : index
    %c0_12 = arith.constant 0 : index
    %14 = vector.load %arg6[%c0_11, %c0_12] : memref<1x256xf32, #tpu.memory_space<vmem>>, vector<1x256xf32>
    tpu.vector_store %arg6[%c0_11, %c0_12], %13 {strides = array<i32>} : memref<1x256xf32, #tpu.memory_space<vmem>>, vector<1x256xf32>,
    return
  }
  func.func @transform_0(%arg0: i32) -> (i32, i32) {
    %c0_i32 = arith.constant 0 : i32
    %c0_i32_0 = arith.constant 0 : i32
    return %arg0, %c0_i32 : i32, i32
  }
  func.func @transform_1(%arg0: i32) -> (i32, i32) {
    %c0_i32 = arith.constant 0 : i32
    %c0_i32_0 = arith.constant 0 : i32
    %c0_i32_1 = arith.constant 0 : i32
    return %c0_i32, %c0_i32_0 : i32, i32
  }
  func.func @transform_2(%arg0: i32) -> (i32, i32) {
    %c0_i32 = arith.constant 0 : i32
    %c0_i32_0 = arith.constant 0 : i32
    %c0_i32_1 = arith.constant 0 : i32
    return %c0_i32, %c0_i32_0 : i32, i32
  }
  func.func @transform_3(%arg0: i32) -> (i32, i32) {
    %c0_i32 = arith.constant 0 : i32
    %c0_i32_0 = arith.constant 0 : i32
    %c0_i32_1 = arith.constant 0 : i32
    return %c0_i32, %c0_i32_0 : i32, i32
  }
  func.func @transform_4(%arg0: i32) -> (i32, i32) {
    %c0_i32 = arith.constant 0 : i32
    %c0_i32_0 = arith.constant 0 : i32
    %c0_i32_1 = arith.constant 0 : i32
    return %c0_i32, %c0_i32_0 : i32, i32
  }
  func.func @transform_5(%arg0: i32) -> (i32, i32) {
    %c0_i32 = arith.constant 0 : i32
    %c0_i32_0 = arith.constant 0 : i32
    return %c0_i32, %arg0 : i32, i32
  }
}

</mosaic_0001>

<bundles_post_ra>
// kernel: _forward_2d.1
= control target key start
LH: loop header
LB: loop body
LE: loop exit
PB: predicated region body
PF: predicated region fallthrough
CT: control target
= control target key end

     0   :  { %11 = vsyncpa [#allocation4], 0  ;;  %s1063_s0 = inlined_call_operand.hbm [shape: bf16[256,128], index: 0, kind: input, shape index: {}]   ;;  %s1064_s1 = inlined_call_operand.hbm [shape: bf16[128,256], index: 1, kind: input, shape index: {}]   ;;  %s1065_s2 = inlined_call_operand.vmem [shape: f32[1,256], index: 2, kind: input, shape index: {}]   ;;  %s1066_s3 = inlined_call_operand.vmem [shape: bf16[1,256], index: 3, kind: input, shape index: {}]   ;;  %s1067_s4 = inlined_call_operand.<no memory space> [shape: f32[1,1], index: 4, kind: input, shape index: {}]   ;;  %s1068_s5 = inlined_call_operand.hbm [shape: f32[1,256], index: 5, kind: output, shape index: {}]  }
   0x1   :  { %12 = vsyncpa [#allocation7], 0 }
   0x2   :  { %13 = vsyncpa [#allocation5], 0  ;;  %s832_s18 = smov [#allocation3]  }
   0x3   :  { %s19_s19 = sshll.u32 %s832_s18, 4  ;;  %s20_s19 = int_to_ptr.vmem [resolvable:$true] %s19_s19 }
   0x4   :  { %s774_s20 = scalar_lea.vmem %s20_s19, 2048  ;;  %p779_p1 = scmp.lt.s32.totalorder %s20_s19, %s20_s19 }
   0x5   :  { %p775_p0 = scmp.ne.s32.totalorder %s20_s19, %s774_s20  ;;  %p780_p2 = scmp.lt.s32.totalorder %s774_s20, %s774_s20 }
   0x7   :  { %p781_p3 = por %p780_p2, %p779_p1 }
   0x9   :  { %p782_p4 = pnand %p781_p3, %p775_p0 }
   0xb   :  { %785 = shalt.err (!%p782_p4)
}
   0xc   :  { %s833_s21 = smov 64   ;;  %s834_s22 = smov 4  }
   0xd   :  { %25 = dma.hbm_to_vmem [thread:$0]  %s1063_s0, 2048, %s20_s19, [#allocation4], %s833_s21, %s833_s21, %s834_s22  }
   0xe   :  { %s835_s25 = smov [#allocation6]  }
   0xf   :  { %s31_s26 = sshll.u32 %s835_s25, 4  ;;  %s32_s26 = int_to_ptr.vmem [resolvable:$true] %s31_s26 }
  0x10   :  { %s794_s27 = scalar_lea.vmem %s32_s26, 2048  ;;  %p799_p6 = scmp.lt.s32.totalorder %s32_s26, %s32_s26 }
  0x11   :  { %p795_p5 = scmp.ne.s32.totalorder %s32_s26, %s794_s27  ;;  %p800_p7 = scmp.lt.s32.totalorder %s794_s27, %s794_s27 }
  0x13   :  { %p801_p8 = por %p800_p7, %p799_p6 }
  0x15   :  { %p802_p9 = pnand %p801_p8, %p795_p5 }
  0x17   :  { %805 = shalt.err (!%p802_p9)
}
  0x18   :  { %s836_s28 = smov 128   ;;  %s837_s29 = smov 8  }
  0x19   :  { %37 = dma.hbm_to_vmem [thread:$0]  %s1064_s1, 2048, %s32_s26, [#allocation7], %s836_s28, %s836_s28, %s837_s29  }
  0x1a   :  { %826 = dma.done.wait [#allocation4], 2048  }
  0x1b   :  { %827 = vsyncadd [#allocation4], 4294965248 }
  0x1c   :  { %828 = dma.done.wait [#allocation7], 2048  }
  0x1d   :  { %829 = vsyncadd [#allocation7], 4294965248  ;;  %v838_v0 = vmov 0   ;;  %v726_v1 = vld [vmem:[#allocation6 + $0x74] ss:$8 sps:$4 sm:$0xff]   ;;  %v750_v17 = vld [vmem:[#allocation3] sm:$0xff]   ;;  %v101_v33 = vlaneseq }
  0x1e   :  { %319 = vmatprep.mubr.bf16.mxu0 %v838_v0  ;;  %v728_v2 = vld [vmem:[#allocation6 + $0x70] ss:$8 sps:$4 sm:$0xff]   ;;  %287 = vmatprep.subr.bf16.mxu0 %v726_v1  ;;  %v729_v3 = vld [vmem:[#allocation6 + $0x64] ss:$8 sps:$4 sm:$0xff]   ;;  %v731_v4 = vld [vmem:[#allocation6 + $0x60] ss:$8 sps:$4 sm:$0xff]  }
  0x1f   :  { %288 = vmatpush1.bf16.msra.mxu0 %v728_v2  ;;  %v732_v5 = vld [vmem:[#allocation6 + $0x54] ss:$8 sps:$4 sm:$0xff]   ;;  %v734_v6 = vld [vmem:[#allocation6 + $0x50] ss:$8 sps:$4 sm:$0xff]   ;;  %v735_v7 = vld [vmem:[#allocation6 + $0x44] ss:$8 sps:$4 sm:$0xff]  }
  0x20   :  { %289 = vmatprep.subr.bf16.mxu0 %v729_v3  ;;  %v737_v8 = vld [vmem:[#allocation6 + $0x40] ss:$8 sps:$4 sm:$0xff]   ;;  %v738_v9 = vld [vmem:[#allocation6 + $0x34] ss:$8 sps:$4 sm:$0xff]   ;;  %v740_v10 = vld [vmem:[#allocation6 + $0x30] ss:$8 sps:$4 sm:$0xff]  }
  0x21   :  { %v741_v11 = vld [vmem:[#allocation6 + $0x24] ss:$8 sps:$4 sm:$0xff]   ;;  %v743_v12 = vld [vmem:[#allocation6 + $0x20] ss:$8 sps:$4 sm:$0xff]   ;;  %v744_v13 = vld [vmem:[#allocation6 + $0x14] ss:$8 sps:$4 sm:$0xff]  }
  0x22   :  { %v746_v14 = vld [vmem:[#allocation6 + $0x10] ss:$8 sps:$4 sm:$0xff]   ;;  %v747_v15 = vld [vmem:[#allocation6 + $0x4] ss:$8 sps:$4 sm:$0xff]   ;;  %v749_v16 = vld [vmem:[#allocation6] ss:$8 sps:$4 sm:$0xff]  }
  0x23   :  { %290 = vmatpush1.bf16.msra.mxu0 %v731_v4  ;;  %v751_v18 = vld [vmem:[#allocation3 + $0x8] sm:$0xff]   ;;  %v752_v19 = vld [vmem:[#allocation3 + $0x10] sm:$0xff]   ;;  %v753_v20 = vld [vmem:[#allocation3 + $0x18] sm:$0xff]   ;;  %v894_v34 = vshrl.u32 %v101_v33, 7  ;;  %s840_s9 = smov [#allocation8]   ;;  %vm665_vm0 = vcmp.lt.s32.totalorder %v101_v33, 256 }
  0x24   :  { %291 = vmatprep.subr.bf16.mxu0 %v732_v5  ;;  %v754_v21 = vld [vmem:[#allocation3 + $0x20] sm:$0xff]   ;;  %v755_v22 = vld [vmem:[#allocation3 + $0x28] sm:$0xff]   ;;  %v756_v23 = vld [vmem:[#allocation3 + $0x30] sm:$0xff]   ;;  %s674_s10 = sshll.u32 %s840_s9, 4  ;;  %s675_s10 = int_to_ptr.vmem [resolvable:$true] %s674_s10 }
  0x25   :  { %v757_v24 = vld [vmem:[#allocation3 + $0x38] sm:$0xff]   ;;  %v758_v25 = vld [vmem:[#allocation3 + $0x40] sm:$0xff]   ;;  %v759_v26 = vld [vmem:[#allocation3 + $0x48] sm:$0xff]   ;;  %v103_v35 = vsub.s32 0, %v894_v34  ;;  %v107_v37 = vsub.s32 1, %v894_v34  ;;  %s806_s11 = scalar_lea.vmem %s675_s10, 32  ;;  %p811_p11 = scmp.lt.s32.totalorder %s675_s10, %s675_s10 }
  0x26   :  { %v760_v27 = vld [vmem:[#allocation3 + $0x50] sm:$0xff]   ;;  %v761_v28 = vld [vmem:[#allocation3 + $0x58] sm:$0xff]   ;;  %v762_v29 = vld [vmem:[#allocation3 + $0x60] sm:$0xff]   ;;  %p807_p10 = scmp.ne.s32.totalorder %s675_s10, %s806_s11  ;;  %p812_p12 = scmp.lt.s32.totalorder %s806_s11, %s806_s11 }
  0x27   :  { %292 = vmatpush1.bf16.msra.mxu0 %v734_v6  ;;  %v763_v30 = vld [vmem:[#allocation3 + $0x68] sm:$0xff]   ;;  %v764_v31 = vld [vmem:[#allocation3 + $0x70] sm:$0xff]   ;;  %v765_v32 = vld [vmem:[#allocation3 + $0x78] sm:$0xff]  }
  0x28   :  { %293 = vmatprep.subr.bf16.mxu0 %v735_v7  ;;  %v99_v36 = vld [vmem:[%s1065_s2] sm:$0x3]  ;;  %p813_p13 = por %p812_p12, %p811_p11 }
  0x29   :  { %v901_v38 = vrot.slane %v99_v36, %v103_v35  ;;  %v903_v40 = vrot.slane %v99_v36, %v107_v37 }
  0x2a   :  { %p814_p0 = pnand %p813_p13, %p807_p10 }
  0x2b   :  { %294 = vmatpush1.bf16.msra.mxu0 %v737_v8 }
  0x2c   :  { %295 = vmatprep.subr.bf16.mxu0 %v738_v9 }
  0x2f   :  { %296 = vmatpush1.bf16.msra.mxu0 %v740_v10 }
  0x30   :  { %297 = vmatprep.subr.bf16.mxu0 %v741_v11 }
  0x33   :  { %298 = vmatpush1.bf16.msra.mxu0 %v743_v12 }
  0x34   :  { %299 = vmatprep.subr.bf16.mxu0 %v744_v13 }
  0x37   :  { %300 = vmatpush1.bf16.msra.mxu0 %v746_v14 }
  0x38   :  { %301 = vmatprep.subr.bf16.mxu0 %v747_v15 }
  0x3b   :  { %302 = vmatpush1.bf16.msra.mxu0 %v749_v16 }
  0x3e   :  { %320 = vmatmul.mubr.bf16.vlgmr.msra.gmra.mxu0 %v750_v17 }
  0x3f   :  { %329 = vmatprep.mubr.bf16.mxu0 %v838_v0 }
  0x46   :  { %330 = vmatmul.mubr.bf16.gmra.mxu0 %v751_v18 }
  0x47   :  { %339 = vmatprep.mubr.bf16.mxu0 %v838_v0 }
  0x4e   :  { %340 = vmatmul.mubr.bf16.gmra.mxu0 %v752_v19 }
  0x4f   :  { %349 = vmatprep.mubr.bf16.mxu0 %v838_v0 }
  0x56   :  { %350 = vmatmul.mubr.bf16.gmra.mxu0 %v753_v20 }
  0x57   :  { %359 = vmatprep.mubr.bf16.mxu0 %v838_v0 }
  0x5e   :  { %360 = vmatmul.mubr.bf16.gmra.mxu0 %v754_v21 }
  0x5f   :  { %369 = vmatprep.mubr.bf16.mxu0 %v838_v0 }
  0x66   :  { %370 = vmatmul.mubr.bf16.gmra.mxu0 %v755_v22 }
  0x67   :  { %379 = vmatprep.mubr.bf16.mxu0 %v838_v0 }
  0x6e   :  { %380 = vmatmul.mubr.bf16.gmra.mxu0 %v756_v23 }
  0x6f   :  { %389 = vmatprep.mubr.bf16.mxu0 %v838_v0 }
  0x76   :  { %390 = vmatmul.mubr.bf16.gmra.mxu0 %v757_v24 }
  0x77   :  { %399 = vmatprep.mubr.bf16.mxu0 %v838_v0 }
  0x7e   :  { %400 = vmatmul.mubr.bf16.gmra.mxu0 %v758_v25 }
  0x7f   :  { %409 = vmatprep.mubr.bf16.mxu0 %v838_v0 }
  0x86   :  { %410 = vmatmul.mubr.bf16.gmra.mxu0 %v759_v26 }
  0x87   :  { %419 = vmatprep.mubr.bf16.mxu0 %v838_v0 }
  0x8e   :  { %420 = vmatmul.mubr.bf16.gmra.mxu0 %v760_v27 }
  0x8f   :  { %429 = vmatprep.mubr.bf16.mxu0 %v838_v0 }
  0x96   :  { %430 = vmatmul.mubr.bf16.gmra.mxu0 %v761_v28 }
  0x97   :  { %439 = vmatprep.mubr.bf16.mxu0 %v838_v0 }
  0x9e   :  { %440 = vmatmul.mubr.bf16.gmra.mxu0 %v762_v29 }
  0x9f   :  { %449 = vmatprep.mubr.bf16.mxu0 %v838_v0 }
  0xa6   :  { %450 = vmatmul.mubr.bf16.gmra.mxu0 %v763_v30 }
  0xa7   :  { %459 = vmatprep.mubr.bf16.mxu0 %v838_v0 }
  0xae   :  { %460 = vmatmul.mubr.bf16.gmra.mxu0 %v764_v31 }
  0xaf   :  { %469 = vmatprep.mubr.bf16.mxu0 %v838_v0 }
  0xb6   :  { %470 = vmatmul.mubr.bf16.gmra.mxu0 %v765_v32 }
  0xfe   :  { %v321_v39 = vpop.f32.mrf.mxu0 }
  0xff   :  { %v322_v42 = vadd.f32 %v321_v39, %v901_v38 }
 0x100   :  { %v323_v41 = vpop.f32.mrf.mxu0 }
 0x101   :  { %v324_v44 = vadd.f32 %v323_v41, %v903_v40  ;;  %v480_v47 = vmax.f32 %v322_v42, 0.0 }
 0x102   :  { %v325_v43 = vpop.f32.mrf.mxu0 }
 0x103   :  { %v326_v45 = vadd.f32 %v325_v43, %v901_v38  ;;  %v481_v51 = vmax.f32 %v324_v44, 0.0 }
 0x104   :  { %v327_v46 = vpop.f32.mrf.mxu0 }
 0x105   :  { %v482_v48 = vmax.f32 %v326_v45, 0.0  ;;  %v328_v49 = vadd.f32 %v327_v46, %v903_v40  ;;  %v839_v46 = vmov 1966171168  }
 0x106   :  { %v331_v50 = vpop.f32.mrf.mxu0 }
 0x107   :  { %v909_v52 = vpack.c.bf16 %v482_v48, %v480_v47  ;;  %v483_v53 = vmax.f32 %v328_v49, 0.0  ;;  %v332_v56 = vadd.f32 %v331_v50, %v901_v38  ;;  %v589_v47 = vunpack.c.l.s4 %v839_v46 }
 0x108   :  { %v333_v54 = vpop.f32.mrf.mxu0 }
 0x109   :  { %v911_v55 = vpack.c.bf16 %v483_v53, %v481_v51  ;;  %v334_v58 = vadd.f32 %v333_v54, %v903_v40  ;;  %v484_v61 = vmax.f32 %v332_v56, 0.0  ;;  %v954_v54 = vld.sshfl [vmem:[%s1066_s3] sm:$0x11 pattern:$0x75316420]  ;;  %v590_v56 = vunpack.c.0.s8 %v589_v47 }
 0x10a   :  { %v335_v57 = vpop.f32.mrf.mxu0 }
 0x10b   :  { %v336_v59 = vadd.f32 %v335_v57, %v901_v38  ;;  %v485_v1 = vmax.f32 %v334_v58, 0.0 }
 0x10c   :  { %v337_v60 = vpop.f32.mrf.mxu0 }
 0x10d   :  { %v486_v62 = vmax.f32 %v336_v59, 0.0  ;;  %v338_v63 = vadd.f32 %v337_v60, %v903_v40  ;;  %v587_v59 = vcombine.high %v954_v54, %v954_v54 }
 0x10e   :  { %v341_v0 = vpop.f32.mrf.mxu0 }
 0x10f   :  { %v917_v2 = vpack.c.bf16 %v486_v62, %v484_v61  ;;  %v487_v3 = vmax.f32 %v338_v63, 0.0  ;;  %v342_v6 = vadd.f32 %v341_v0, %v901_v38  ;;  %v961_v62 = vsub.s32 %v590_v56, %v894_v34 }
 0x110   :  { %v343_v4 = vpop.f32.mrf.mxu0 }
 0x111   :  { %v919_v5 = vpack.c.bf16 %v487_v3, %v485_v1  ;;  %v344_v8 = vadd.f32 %v343_v4, %v903_v40  ;;  %v488_v11 = vmax.f32 %v342_v6, 0.0  ;;  %v601_v6 = vrot.slane %v587_v59, %v961_v62 }
 0x112   :  { %v345_v7 = vpop.f32.mrf.mxu0 }
 0x113   :  { %v346_v9 = vadd.f32 %v345_v7, %v901_v38  ;;  %v489_v15 = vmax.f32 %v344_v8, 0.0  ;;  %636 = vmatprep.mubr.bf16.mxu1 %v601_v6 }
 0x114   :  { %v347_v10 = vpop.f32.mrf.mxu0 }
 0x115   :  { %v490_v12 = vmax.f32 %v346_v9, 0.0  ;;  %v348_v13 = vadd.f32 %v347_v10, %v903_v40 }
 0x116   :  { %v351_v14 = vpop.f32.mrf.mxu0 }
 0x117   :  { %v925_v16 = vpack.c.bf16 %v490_v12, %v488_v11  ;;  %v491_v17 = vmax.f32 %v348_v13, 0.0  ;;  %v352_v20 = vadd.f32 %v351_v14, %v901_v38 }
 0x118   :  { %v927_v18 = vpop.f32.mrf.mxu0 }
 0x119   :  { %v929_v19 = vpack.c.bf16 %v491_v17, %v489_v15  ;;  %v492_v24 = vmax.f32 %v352_v20, 0.0 }
 0x11a   :  { %v355_v21 = vpop.f32.mrf.mxu0 }
 0x11b   :  { %v356_v22 = vadd.f32 %v355_v21, %v901_v38 }
 0x11c   :  { %v933_v23 = vpop.f32.mrf.mxu0 }
 0x11d   :  { %v494_v25 = vmax.f32 %v356_v22, 0.0 }
 0x11e   :  { %v935_v26 = vpop.f32.mrf.mxu0 }
 0x11f   :  { %v937_v27 = vpack.c.bf16 %v494_v25, %v492_v24 }
 0x120   :  { %v939_v28 = vpop.f32.mrf.mxu0 }
 0x122   :  { %v941_v29 = vpop.f32.mrf.mxu0 }
 0x124   :  { %v943_v30 = vpop.f32.mrf.mxu0 }
 0x126   :  { %v945_v31 = vpop.f32.mrf.mxu0 }
 0x128   :  { %v373_v32 = vpop.f32.mrf.mxu0 }
 0x129   :  { %v374_v21 = vadd.f32 %v373_v32, %v903_v40 }
 0x12a   :  { %v375_v35 = vpop.f32.mrf.mxu0 }
 0x12b   :  { %v501_v47 = vmax.f32 %v374_v21, 0.0  ;;  %v376_v32 = vadd.f32 %v375_v35, %v901_v38  ;;  %v354_v21 = vadd.f32 %v927_v18, %v903_v40 }
 0x12c   :  { %v377_v36 = vpop.f32.mrf.mxu0 }
 0x12d   :  { %v378_v13 = vadd.f32 %v377_v36, %v903_v40 }
 0x12e   :  { %v381_v37 = vpop.f32.mrf.mxu0 }
 0x12f   :  { %v382_v17 = vadd.f32 %v381_v37, %v901_v38  ;;  %v503_v36 = vmax.f32 %v378_v13, 0.0  ;;  %v358_v13 = vadd.f32 %v933_v23, %v903_v40 }
 0x130   :  { %v383_v39 = vpop.f32.mrf.mxu0 }
 0x131   :  { %v384_v57 = vadd.f32 %v383_v39, %v903_v40 }
 0x132   :  { %v385_v41 = vpop.f32.mrf.mxu0 }
 0x133   :  { %v505_v7 = vmax.f32 %v384_v57, 0.0  ;;  %v386_v10 = vadd.f32 %v385_v41, %v901_v38 }
 0x134   :  { %v387_v42 = vpop.f32.mrf.mxu0 }
 0x135   :  { %v388_v48 = vadd.f32 %v387_v42, %v903_v40  ;;  %v506_v39 = vmax.f32 %v386_v10, 0.0 }
 0x136   :  { %v391_v43 = vpop.f32.mrf.mxu0 }
 0x137   :  { %v392_v51 = vadd.f32 %v391_v43, %v901_v38  ;;  %v507_v63 = vmax.f32 %v388_v48, 0.0 }
 0x138   :  { %v393_v44 = vpop.f32.mrf.mxu0 }
 0x139   :  { %v394_v49 = vadd.f32 %v393_v44, %v903_v40  ;;  %v508_v3 = vmax.f32 %v392_v51, 0.0  ;;  %v558_v34 = vpack.c.bf16 %v507_v63, %v505_v7  ;;  %v368_v51 = vadd.f32 %v943_v30, %v903_v40 }
 0x13a   :  { %v395_v45 = vpop.f32.mrf.mxu0 }
 0x13b   :  { %v396_v50 = vadd.f32 %v395_v45, %v901_v38  ;;  %v509_v0 = vmax.f32 %v394_v49, 0.0  ;;  %v504_v45 = vmax.f32 %v382_v17, 0.0  ;;  %v362_v17 = vadd.f32 %v935_v26, %v901_v38 }
 0x13c   :  { %v397_v53 = vpop.f32.mrf.mxu0  ;;  %v493_v26 = vmax.f32 %v354_v21, 0.0 }
 0x13d   :  { %v398_v58 = vadd.f32 %v397_v53, %v903_v40  ;;  %v510_v60 = vmax.f32 %v396_v50, 0.0  ;;  %v557_v49 = vpack.c.bf16 %v506_v39, %v504_v45  ;;  %v556_v53 = vpack.c.bf16 %v503_v36, %v501_v47 }
 0x13e   :  { %v401_v61 = vpop.f32.mrf.mxu0  ;;  %v495_v39 = vmax.f32 %v358_v13, 0.0 }
 0x13f   :  { %v511_v1 = vmax.f32 %v398_v58, 0.0  ;;  %v402_v8 = vadd.f32 %v401_v61, %v901_v38  ;;  %v559_v12 = vpack.c.bf16 %v510_v60, %v508_v3  ;;  %v372_v58 = vadd.f32 %v945_v31, %v901_v38 }
 0x140   :  { %v403_v4 = vpop.f32.mrf.mxu0  ;;  %v364_v60 = vadd.f32 %v939_v28, %v903_v40  ;;  %v366_v28 = vadd.f32 %v941_v29, %v901_v38 }
 0x141   :  { %v560_v9 = vpack.c.bf16 %v511_v1, %v509_v0  ;;  %v404_v14 = vadd.f32 %v403_v4, %v903_v40  ;;  %v512_v22 = vmax.f32 %v402_v8, 0.0  ;;  %v502_v0 = vmax.f32 %v376_v32, 0.0 }
 0x142   :  { %v405_v11 = vpop.f32.mrf.mxu0  ;;  %v499_v1 = vmax.f32 %v368_v51, 0.0  ;;  %v500_v7 = vmax.f32 %v372_v58, 0.0  ;;  %v497_v31 = vmax.f32 %v364_v60, 0.0  ;;  %v552_v32 = vpack.c.bf16 %v495_v39, %v493_v26 }
 0x143   :  { %v406_v15 = vadd.f32 %v405_v11, %v901_v38  ;;  %604 = vmatprep.subr.bf16.mxu1 %v560_v9  ;;  %v513_v42 = vmax.f32 %v404_v14, 0.0 }
 0x144   :  { %v407_v20 = vpop.f32.mrf.mxu0  ;;  %605 = vmatpush1.bf16.xpose.msra.mxu1 %v559_v12  ;;  %v555_v11 = vpack.c.bf16 %v502_v0, %v500_v7 }
 0x145   :  { %v514_v24 = vmax.f32 %v406_v15, 0.0  ;;  %v408_v25 = vadd.f32 %v407_v20, %v903_v40  ;;  %606 = vmatprep.subr.bf16.mxu1 %v558_v34  ;;  %v554_v34 = vpack.c.bf16 %v499_v1, %v497_v31 }
 0x146   :  { %v411_v41 = vpop.f32.mrf.mxu0 }
 0x147   :  { %v972_v43 = vpack.c.bf16 %v514_v24, %v512_v22  ;;  %v515_v44 = vmax.f32 %v408_v25, 0.0  ;;  %v412_v48 = vadd.f32 %v411_v41, %v901_v38  ;;  %v498_v25 = vmax.f32 %v366_v28, 0.0 }
 0x148   :  { %v413_v46 = vpop.f32.mrf.mxu0 }
 0x149   :  { %v974_v37 = vpack.c.bf16 %v515_v44, %v513_v42  ;;  %v414_v56 = vadd.f32 %v413_v46, %v903_v40  ;;  %v516_v61 = vmax.f32 %v412_v48, 0.0  ;;  %v496_v44 = vmax.f32 %v362_v17, 0.0 }
 0x14a   :  { %v415_v50 = vpop.f32.mrf.mxu0 }
 0x14b   :  { %v416_v57 = vadd.f32 %v415_v50, %v901_v38  ;;  %v517_v3 = vmax.f32 %v414_v56, 0.0  ;;  %v553_v47 = vpack.c.bf16 %v498_v25, %v496_v44 }
 0x14c   :  { %v417_v59 = vpop.f32.mrf.mxu0  ;;  %607 = vmatpush1.bf16.xpose.msra.mxu1 %v557_v49 }
 0x14d   :  { %v518_v35 = vmax.f32 %v416_v57, 0.0  ;;  %v418_v63 = vadd.f32 %v417_v59, %v903_v40  ;;  %608 = vmatprep.subr.bf16.mxu1 %v556_v53 }
 0x14e   :  { %v421_v30 = vpop.f32.mrf.mxu0 }
 0x14f   :  { %v987_v4 = vpack.c.bf16 %v518_v35, %v516_v61  ;;  %v519_v6 = vmax.f32 %v418_v63, 0.0  ;;  %v422_v10 = vadd.f32 %v421_v30, %v901_v38 }
 0x150   :  { %v423_v8 = vpop.f32.mrf.mxu0 }
 0x151   :  { %v989_v9 = vpack.c.bf16 %v519_v6, %v517_v3  ;;  %v424_v14 = vadd.f32 %v423_v8, %v903_v40  ;;  %v520_v22 = vmax.f32 %v422_v10, 0.0 }
 0x152   :  { %v425_v12 = vpop.f32.mrf.mxu0 }
 0x153   :  { %v426_v15 = vadd.f32 %v425_v12, %v901_v38  ;;  %v521_v41 = vmax.f32 %v424_v14, 0.0 }
 0x154   :  { %v427_v20 = vpop.f32.mrf.mxu0  ;;  %609 = vmatpush1.bf16.xpose.msra.mxu1 %v555_v11 }
 0x155   :  { %v522_v29 = vmax.f32 %v426_v15, 0.0  ;;  %v428_v24 = vadd.f32 %v427_v20, %v903_v40  ;;  %610 = vmatprep.subr.bf16.mxu1 %v554_v34 }
 0x156   :  { %v431_v23 = vpop.f32.mrf.mxu0 }
 0x157   :  { %v1003_v36 = vpack.c.bf16 %v522_v29, %v520_v22  ;;  %v523_v42 = vmax.f32 %v428_v24, 0.0  ;;  %v432_v18 = vadd.f32 %v431_v23, %v901_v38 }
 0x158   :  { %v1005_v45 = vpop.f32.mrf.mxu0 }
 0x159   :  { %v1007_v46 = vpack.c.bf16 %v523_v42, %v521_v41  ;;  %v524_v51 = vmax.f32 %v432_v18, 0.0 }
 0x15a   :  { %v435_v48 = vpop.f32.mrf.mxu0 }
 0x15b   :  { %v436_v49 = vadd.f32 %v435_v48, %v901_v38 }
 0x15c   :  { %v1011_v50 = vpop.f32.mrf.mxu0  ;;  %611 = vmatpush1.bf16.xpose.msra.mxu1 %v553_v47 }
 0x15d   :  { %v526_v53 = vmax.f32 %v436_v49, 0.0  ;;  %612 = vmatprep.subr.bf16.mxu1 %v552_v32 }
 0x15e   :  { %v1013_v56 = vpop.f32.mrf.mxu0 }
 0x15f   :  { %v1015_v57 = vpack.c.bf16 %v526_v53, %v524_v51 }
 0x160   :  { %v443_v58 = vpop.f32.mrf.mxu0 }
 0x161   :  { %v444_v47 = vadd.f32 %v443_v58, %v903_v40 }
 0x162   :  { %v445_v59 = vpop.f32.mrf.mxu0 }
 0x163   :  { %v529_v51 = vmax.f32 %v444_v47, 0.0  ;;  %v446_v53 = vadd.f32 %v445_v59, %v901_v38 }
 0x164   :  { %v447_v60 = vpop.f32.mrf.mxu0  ;;  %613 = vmatpush1.bf16.xpose.msra.mxu1 %v937_v27 }
 0x165   :  { %614 = vmatprep.subr.bf16.mxu1 %v929_v19  ;;  %v448_v44 = vadd.f32 %v447_v60, %v903_v40  ;;  %v442_v60 = vadd.f32 %v1013_v56, %v901_v38  ;;  %v530_v58 = vmax.f32 %v446_v53, 0.0 }
 0x166   :  { %v451_v61 = vpop.f32.mrf.mxu0 }
 0x167   :  { %v452_v18 = vadd.f32 %v451_v61, %v901_v38  ;;  %v531_v32 = vmax.f32 %v448_v44, 0.0  ;;  %v434_v61 = vadd.f32 %v1005_v45, %v903_v40 }
 0x168   :  { %v453_v35 = vpop.f32.mrf.mxu0 }
 0x169   :  { %v454_v29 = vadd.f32 %v453_v35, %v903_v40  ;;  %v532_v49 = vmax.f32 %v452_v18, 0.0 }
 0x16a   :  { %v455_v63 = vpop.f32.mrf.mxu0 }
 0x16b   :  { %v533_v39 = vmax.f32 %v454_v29, 0.0  ;;  %v456_v41 = vadd.f32 %v455_v63, %v901_v38  ;;  %v438_v63 = vadd.f32 %v1011_v50, %v903_v40 }
 0x16c   :  { %v457_v0 = vpop.f32.mrf.mxu0  ;;  %615 = vmatpush1.bf16.xpose.msra.mxu1 %v925_v16 }
 0x16d   :  { %616 = vmatprep.subr.bf16.mxu1 %v919_v5  ;;  %v458_v21 = vadd.f32 %v457_v0, %v903_v40  ;;  %v534_v48 = vmax.f32 %v456_v41, 0.0  ;;  %v570_v0 = vpack.c.bf16 %v531_v32, %v529_v51 }
 0x16e   :  { %v461_v30 = vpop.f32.mrf.mxu0 }
 0x16f   :  { %v535_v25 = vmax.f32 %v458_v21, 0.0  ;;  %v571_v35 = vpack.c.bf16 %v534_v48, %v532_v49 }
 0x170   :  { %v463_v1 = vpop.f32.mrf.mxu0 }
 0x171   :  { %v464_v28 = vadd.f32 %v463_v1, %v903_v40  ;;  %v572_v26 = vpack.c.bf16 %v535_v25, %v533_v39  ;;  %v528_v1 = vmax.f32 %v442_v60, 0.0 }
 0x172   :  { %v465_v3 = vpop.f32.mrf.mxu0 }
 0x173   :  { %v537_v14 = vmax.f32 %v464_v28, 0.0  ;;  %v466_v17 = vadd.f32 %v465_v3, %v901_v38  ;;  %v525_v3 = vmax.f32 %v434_v61, 0.0 }
 0x174   :  { %v467_v6 = vpop.f32.mrf.mxu0  ;;  %617 = vmatpush1.bf16.xpose.msra.mxu1 %v917_v2 }
 0x175   :  { %618 = vmatprep.subr.bf16.mxu1 %v911_v55  ;;  %v468_v19 = vadd.f32 %v467_v6, %v903_v40  ;;  %v538_v24 = vmax.f32 %v466_v17, 0.0  ;;  %v569_v6 = vpack.c.bf16 %v530_v58, %v528_v1 }
 0x176   :  { %v471_v7 = vpop.f32.mrf.mxu0 }
 0x177   :  { %v472_v16 = vadd.f32 %v471_v7, %v901_v38  ;;  %v539_v55 = vmax.f32 %v468_v19, 0.0 }
 0x178   :  { %v473_v27 = vpop.f32.mrf.mxu0 }
 0x179   :  { %v474_v31 = vadd.f32 %v473_v27, %v903_v40  ;;  %v540_v34 = vmax.f32 %v472_v16, 0.0  ;;  %v574_v22 = vpack.c.bf16 %v539_v55, %v537_v14 }
 0x17a   :  { %v475_v8 = vpop.f32.mrf.mxu0 }
 0x17b   :  { %v476_v10 = vadd.f32 %v475_v8, %v901_v38  ;;  %v541_v12 = vmax.f32 %v474_v31, 0.0 }
 0x17c   :  { %v477_v5 = vpop.f32.mrf.mxu0  ;;  %619 = vmatpush1.bf16.xpose.msra.mxu1 %v909_v52  ;;  %v462_v52 = vadd.f32 %v461_v30, %v901_v38  ;;  %v527_v30 = vmax.f32 %v438_v63, 0.0  ;;  %v594_v38 = vrot.slane %v954_v54, %v961_v62 }
 0x17d   :  { %v478_v2 = vadd.f32 %v477_v5, %v903_v40  ;;  %v542_v11 = vmax.f32 %v476_v10, 0.0  ;;  %v578_v40 = vstv %s1067_s4 }
 0x17e   :  { %v536_v23 = vmax.f32 %v462_v52, 0.0  ;;  %v568_v7 = vpack.c.bf16 %v527_v30, %v525_v3 }
 0x17f   :  { %v543_v13 = vmax.f32 %v478_v2, 0.0  ;;  %v575_v20 = vpack.c.bf16 %v542_v11, %v540_v34 }
 0x180   :  { %v573_v42 = vpack.c.bf16 %v538_v24, %v536_v23 }
 0x181   :  { %v576_v15 = vpack.c.bf16 %v543_v13, %v541_v12 }
 0x183   :  { %620 = vmatprep.subr.bf16.mxu1 %v576_v15 }
 0x184   :  { %621 = vmatpush2.bf16.xpose.msra.mxu1 %v575_v20 }
 0x185   :  { %622 = vmatprep.subr.bf16.mxu1 %v574_v22 }
 0x18c   :  { %623 = vmatpush2.bf16.xpose.msra.mxu1 %v573_v42 }
 0x18d   :  { %624 = vmatprep.subr.bf16.mxu1 %v572_v26 }
 0x194   :  { %625 = vmatpush2.bf16.xpose.msra.mxu1 %v571_v35 }
 0x195   :  { %626 = vmatprep.subr.bf16.mxu1 %v570_v0 }
 0x19c   :  { %627 = vmatpush2.bf16.xpose.msra.mxu1 %v569_v6 }
 0x19d   :  { %628 = vmatprep.subr.bf16.mxu1 %v568_v7 }
 0x1a4   :  { %629 = vmatpush2.bf16.xpose.msra.mxu1 %v1015_v57 }
 0x1a5   :  { %630 = vmatprep.subr.bf16.mxu1 %v1007_v46 }
 0x1ac   :  { %631 = vmatpush2.bf16.xpose.msra.mxu1 %v1003_v36 }
 0x1ad   :  { %632 = vmatprep.subr.bf16.mxu1 %v989_v9 }
 0x1b4   :  { %633 = vmatpush2.bf16.xpose.msra.mxu1 %v987_v4 }
 0x1b5   :  { %634 = vmatprep.subr.bf16.mxu1 %v974_v37 }
 0x1bc   :  { %635 = vmatpush2.bf16.xpose.msra.mxu1 %v972_v43 }
 0x1c3   :  { %637 = vmatmul.mubr.bf16.vlgmr.msra.gmra.mxu1 %v594_v38 }
 0x283   :  { %v638_v45 = vpop.f32.mrf.mxu1 }
 0x284   :  { %v639_v50 = vadd.f32 %v638_v45, %v578_v40 }
 0x285   :  { %v640_v46 = vpop.f32.mrf.mxu1 }
 0x286   :  { %v641_v36 = vadd.f32 %v640_v46, %v578_v40 }
 0x287   :  { %v642_v56 = vpop.f32.mrf.mxu1 }
 0x288   :  { %v647_v9 = vcombine.low %v639_v50, %v641_v36 }
 0x289   :  { %v643_v57 = vpop.f32.mrf.mxu1 }
 0x28a   :  { %v654_v37 = vrot.slane %v647_v9, %v961_v62 }
 0x28c   :  { %v661_v54 = vrot.slane %v654_v37, %v961_v62 }
 0x28e   :  { %667 = vst.msk [vmem:[#allocation8] sm:$0x3] %vm665_vm0, %v661_v54 }
 0x28f   :  { %817 = shalt.err (!%p814_p0)
}
 0x290   :  { %677 = dma.vmem_to_hbm [thread:$0]  %s675_s10, 32, %s1068_s5, [#allocation5]  }
 0x291   :  { %830 = dma.done.wait [#allocation5], 32  }
 0x292   :  { %831 = vsyncadd [#allocation5], 4294967264 }
 0x293   :  { %681 = vsyncpa [#allocation4], 1 }
 0x294   :  { %682 = vsyncpa [#allocation7], 1 }
 0x295   :  { %683 = vsyncpa [#allocation5], 1 }

</bundles_post_ra>
